<compile_context>
chip_gen: v6e
topology: v6e:2x2x1
jax: 0.10.0
libtpu: 0.0.40
codegen_flags: <defaults>
</compile_context>

<pallas_src>
import functools

import numpy as np
import jax
import jax.numpy as jnp
from jax.experimental import pallas as pl
from jax.experimental.pallas import tpu as pltpu

# Test hook: when set, overrides the derived per-step input-block VMEM budget (bytes).
_TILE_BUDGET_OVERRIDE = None


def _round_up(x, m):
    return -(-x // m) * m


def _cdiv(a, b):
    return -(-a // b)


def _vmem_budgets():
    """(vmem_limit_bytes, input_tile_budget_bytes) derived from the TPU generation."""
    try:
        phys = int(getattr(pltpu.get_tpu_info(), "vmem_capacity_bytes", 64 * 1024 * 1024))
    except Exception:
        phys = 64 * 1024 * 1024            # conservative (v7x-sized) fallback
    vmem_limit = min((phys * 3) // 4, 96 * 1024 * 1024)   # ~96 MiB v5e/v6e, ~48 MiB v7x
    tile_budget = (vmem_limit * 3) // 5                   # rest: output, temps, headroom
    return vmem_limit, tile_budget


def _lane_bytes(second_minor, dtype, lead=1, n_buffers=2):
    """Sublane-padded VMEM bytes per lane for one (double-buffered) input block."""
    itemsize = np.dtype(dtype).itemsize
    sub = 32 // itemsize                   # 8 for f32, 16 for bf16, 32 for int8
    return n_buffers * lead * _round_up(second_minor, sub) * itemsize


def _choose_lane_tiling(hw, bytes_per_lane, tile_budget):
    """Pick (lane_tile, n_tiles): biggest lane tile whose input blocks fit the budget."""
    max_lanes = max(128, (tile_budget // max(bytes_per_lane, 1)) // 128 * 128)
    if hw <= max_lanes:
        return hw, 1                       # one exact tile (block == full lane extent)
    hw128 = _round_up(hw, 128)
    n_tiles = _cdiv(hw128, max_lanes)
    lane_tile = _round_up(_cdiv(hw128, n_tiles), 128)
    return lane_tile, _cdiv(hw, lane_tile)


def _make_kernel(n_vectors, n_scale_pairs, scalar_scale_path, out_rows,
                 hw, lane_tile, tiles_per_split):
    """Kernel for a fixed (n_vectors, n_scale_pairs, scalar_scale_path) configuration.

    Inputs per grid step (s, b, j):
      [scales_to_kp factors (SMEM, (n_scale_pairs,)) if scalar_scale_path],
      x_intensity (1,C,LT), target_intensity (1,C+1,LT),
      per vector i: x_reg (1,C,2,LT), x_spread (1,C,LT), t_reg (1,C,2,LT),
      then (scalar path)  target_scale (1,C,LT), x_scale_0..                 (each (1,C,LT))
        or (fallback)     per scale j: x_scale_j, target_scale_j             (each (1,C,LT)).
    Output block (1,1,out_rows,128): row k holds partial sum k
      [ce_sum, ce_count, reg_count, reg_sum_0.., scale_sum_0..] broadcast over lanes.
    """
    have_factors = bool(n_scale_pairs) and scalar_scale_path

    def kernel(*refs):
        out_ref = refs[-1]
        in_refs = refs[:-1]
        pos = 0
        factors_ref = None
        if have_factors:
            factors_ref = in_refs[pos]
            pos += 1
        x_int = in_refs[pos][0].astype(jnp.float32); pos += 1       # (C, LT)
        t_int = in_refs[pos][0].astype(jnp.float32); pos += 1       # (C+1, LT)
        c = x_int.shape[0]
        t_fg = t_int[:c, :]                                         # foreground channels
        t_bg = t_int[c:, :]                                         # (1, LT) background

        # Lane-validity mask: no wrapper padding, so the last / phantom lane tile reads
        # garbage lanes past HW.  Everything is combined with jnp.where (never mask*value)
        # so NaN/Inf garbage cannot reach the reductions.
        tile_idx = pl.program_id(0) * tiles_per_split + pl.program_id(2)
        lane_ids = jax.lax.broadcasted_iota(jnp.int32, (1, lane_tile), 1)
        lane_valid = (tile_idx * lane_tile + lane_ids) < hw          # (1, LT)

        bce_mask = jnp.logical_and(lane_valid, (t_fg + t_bg) > 0.5)  # (C, LT)
        reg_mask = jnp.logical_and(lane_valid, t_fg > 0.5)

        # binary_cross_entropy_with_logits (numerically stable elementwise form)
        bce = (jnp.maximum(x_int, 0.0) - x_int * t_fg
               + jnp.log1p(jnp.exp(-jnp.abs(x_int))))

        sums = [jnp.sum(jnp.where(bce_mask, bce, 0.0)),
                jnp.sum(bce_mask.astype(jnp.float32)),
                jnp.sum(reg_mask.astype(jnp.float32))]

        for _ in range(n_vectors):
            x_reg = in_refs[pos][0].astype(jnp.float32)              # (C, 2, LT)
            logb = in_refs[pos + 1][0].astype(jnp.float32)           # (C, LT)
            t_reg = in_refs[pos + 2][0].astype(jnp.float32)          # (C, 2, LT)
            pos += 3
            d = x_reg - t_reg
            norm = jnp.sqrt(jnp.sum(d * d, axis=1))                  # sublane-pair reduce
            lap = 0.694 + logb + norm * jnp.exp(-logb)
            sums.append(jnp.sum(jnp.where(reg_mask, lap, 0.0)))

        if n_scale_pairs:
            if scalar_scale_path:
                t_scale = in_refs[pos][0].astype(jnp.float32); pos += 1
                for k in range(n_scale_pairs):
                    x_scale = in_refs[pos][0].astype(jnp.float32); pos += 1
                    diff = jnp.abs(x_scale - t_scale * factors_ref[k])   # SMEM scalar mul
                    sums.append(jnp.sum(jnp.where(reg_mask, diff, 0.0)))
            else:
                for _ in range(n_scale_pairs):
                    x_scale = in_refs[pos][0].astype(jnp.float32)
                    t_sk = in_refs[pos + 1][0].astype(jnp.float32)
                    pos += 2
                    diff = jnp.abs(x_scale - t_sk)
                    sums.append(jnp.sum(jnp.where(reg_mask, diff, 0.0)))

        # Lane-dense (out_rows, 128) partial-sum tile; row k holds partial sum k.
        row_ids = jax.lax.broadcasted_iota(jnp.int32, (out_rows, 128), 0)
        tile = jnp.zeros((out_rows, 128), jnp.float32)
        for k, s in enumerate(sums):
            tile = jnp.where(row_ids == k, s, tile)

        lane_step = pl.program_id(2)

        @pl.when(lane_step == 0)
        def _init():
            out_ref[0, 0] = tile

        @pl.when(lane_step > 0)
        def _accumulate():
            out_ref[0, 0] = out_ref[0, 0] + tile

    return kernel


@functools.lru_cache(maxsize=None)
def _build_loss_fn(B, C, HW, lane_tile, n_tiles, n_split, n_vectors, n_scale_pairs,
                   scalar_scale_path, vmem_limit):
    n_out = 3 + n_vectors + n_scale_pairs
    out_rows = _round_up(max(n_out, 1), 8)
    tiles_per_split = _cdiv(n_tiles, n_split)
    kernel = _make_kernel(n_vectors, n_scale_pairs, scalar_scale_path, out_rows,
                          HW, lane_tile, tiles_per_split)

    last_block = n_tiles - 1

    def _lane(s, j):
        # Phantom tiles (past the real lane range of an uneven split) re-read the last
        # real block; the kernel's lane-validity mask zeroes their contribution.
        return jnp.minimum(s * tiles_per_split + j, last_block)

    def spec3(rows):
        return pl.BlockSpec((1, rows, lane_tile), lambda s, b, j: (b, 0, _lane(s, j)))

    def spec4():
        return pl.BlockSpec((1, C, 2, lane_tile), lambda s, b, j: (b, 0, 0, _lane(s, j)))

    in_specs = []
    if n_scale_pairs and scalar_scale_path:
        in_specs.append(pl.BlockSpec(memory_space=pltpu.MemorySpace.SMEM))
    in_specs += [spec3(C), spec3(C + 1)]                  # x_intensity, target_intensity
    for _ in range(n_vectors):
        in_specs += [spec4(), spec3(C), spec4()]          # x_reg, x_spread, t_reg
    if n_scale_pairs:
        if scalar_scale_path:
            in_specs += [spec3(C)] * (1 + n_scale_pairs)  # shared target_scale + x_scales
        else:
            in_specs += [spec3(C)] * (2 * n_scale_pairs)
    # TODO(synk): pipeline_mode=pl.Buffered(3) on the large inputs could hide per-step DMA
    # when n_tiles >= 3, but only where the sublane-padded accounting leaves VMEM headroom.

    call = pl.pallas_call(
        kernel,
        out_shape=jax.ShapeDtypeStruct((n_split, B, out_rows, 128), jnp.float32),
        grid=(n_split, B, tiles_per_split),
        in_specs=in_specs,
        out_specs=pl.BlockSpec((1, 1, out_rows, 128), lambda s, b, j: (s, b, 0, 0)),
        compiler_params=pltpu.CompilerParams(
            dimension_semantics=("parallel", "parallel", "arbitrary"),
            vmem_limit_bytes=vmem_limit),
    )

    def run(*args):
        def flat(a):  # free reshapes, fused with the pallas call inside jit
            if a.ndim == 5:
                return jnp.reshape(a, (a.shape[0], a.shape[1], a.shape[2], HW))
            if a.ndim == 4:
                return jnp.reshape(a, (a.shape[0], a.shape[1], HW))
            return a
        out = call(*[flat(a) for a in args])                      # (n_split,B,out_rows,128)
        totals = jnp.sum(out[:, :, :n_out, 0], axis=(0, 1))       # (n_out,)
        inv = 1.0 / (1000.0 * B)
        ce = totals[0] / jnp.maximum(totals[1], 1.0)              # guarded; None path is host-side
        regs = totals[3:3 + n_vectors] * inv
        scales = totals[3 + n_vectors:3 + n_vectors + n_scale_pairs] * inv
        return ce, totals[1:3], regs, scales

    return jax.jit(run)


class CompositeLoss:
    default_background_weight = 1.0
    default_multiplicity_correction = False
    default_independence_scale = 3.0

    def __init__(self, head_name, regression_loss=None, *, n_vectors, n_scales, sigmas=None):
        if sigmas is None:
            sigmas = [[1.0] for _ in range(n_vectors)]
        self.background_weight = self.default_background_weight
        self.multiplicity_correction = self.default_multiplicity_correction
        self.independence_scale = self.default_independence_scale
        self.n_vectors = n_vectors
        self.n_scales = n_scales
        if self.n_scales:
            assert len(sigmas) == n_scales
        assert len(sigmas) == n_vectors
        s_np = np.asarray(sigmas, dtype=np.float32)
        # same shape as the torch buffer: (1, n_vectors, len_sigma, 1, 1)
        self._s2k_np = s_np[None, :, :, None, None]
        self.scales_to_kp = jnp.asarray(self._s2k_np)
        self._factors_cache = None
        # TODO(synk): only the default laplace regression loss is implemented in-kernel
        # (regression losses with a `.scale` attribute are not supported).
        assert regression_loss is None
        # Set to False to skip the tiny host read that reproduces the torch module's
        # "return None on empty masks" behaviour (keeps forward fully asynchronous).
        self.check_empty_masks = True
        self.field_names = (['{}.c'.format(head_name)]
                            + ['{}.vec{}'.format(head_name, i + 1) for i in range(n_vectors)]
                            + ['{}.scales{}'.format(head_name, i + 1) for i in range(n_scales)])
        self.bce_blackout = None

    def forward(self, x, t):
        assert len(x) == 1 + 2 * self.n_vectors + self.n_scales
        nv, ns = self.n_vectors, self.n_scales
        x_intensity = jnp.asarray(x[0])
        x_regs = [jnp.asarray(a) for a in x[1:1 + nv]]
        x_spreads = [jnp.asarray(a) for a in x[1 + nv:1 + 2 * nv]]
        x_scales = [jnp.asarray(a) for a in x[1 + 2 * nv:1 + 2 * nv + ns]] if ns else []
        assert len(t) == 1 + nv + 1
        target_intensity = jnp.asarray(t[0])
        target_regs = [jnp.asarray(a) for a in t[1:1 + nv]]
        target_scale = jnp.asarray(t[-1])

        B, C, H, W = x_intensity.shape
        HW = H * W

        # TODO(synk): bce_blackout, background_weight != 1.0 and multiplicity_correction
        # branches are not implemented (module defaults only).

        # mirrors torch's `zip(x_scales, self.scales_to_kp)` (iterates the size-1 leading dim)
        n_sp = min(len(x_scales), self._s2k_np.shape[0]) if ns else 0
        s2k_items = [self._s2k_np[k] for k in range(n_sp)]
        scalar_path = all(item.size == 1 for item in s2k_items) if n_sp else True

        vmem_limit, tile_budget = _vmem_budgets()
        if _TILE_BUDGET_OVERRIDE is not None:
            tile_budget = int(_TILE_BUDGET_OVERRIDE)

        # Sublane-padded, double-buffered per-lane VMEM cost of every input block.
        bpl = _lane_bytes(C, x_intensity.dtype) + _lane_bytes(C + 1, target_intensity.dtype)
        for i in range(nv):
            bpl += _lane_bytes(2, x_regs[i].dtype, lead=C)
            bpl += _lane_bytes(C, x_spreads[i].dtype)
            bpl += _lane_bytes(2, target_regs[i].dtype, lead=C)
        if n_sp:
            if scalar_path:
                bpl += _lane_bytes(C, target_scale.dtype)
            for k in range(n_sp):
                bpl += _lane_bytes(C, x_scales[k].dtype)
                if not scalar_path:
                    bpl += _lane_bytes(C, jnp.float32)
        lane_tile, n_tiles = _choose_lane_tiling(HW, bpl, tile_budget)

        # 2-way lane split so both v7x TensorCores stream HBM when the batch axis alone
        # cannot be split evenly; harmless (serial loop) on single-core v5e/v6e.
        n_split = 2 if (n_tiles >= 2 and B % 2 == 1) else 1

        inputs = []
        if n_sp and scalar_path:
            if self._factors_cache is None or self._factors_cache.shape[0] != n_sp:
                self._factors_cache = jnp.asarray(
                    [float(item.reshape(())) for item in s2k_items], dtype=jnp.float32)
            inputs.append(self._factors_cache)
        inputs.append(x_intensity)
        inputs.append(target_intensity)          # full (B, C+1, H, W); fg/bg split in-kernel
        for i in range(nv):
            inputs += [x_regs[i], x_spreads[i], target_regs[i]]   # native (B,C,2,H,W) layout
        if n_sp:
            if scalar_path:
                ts = target_scale
                if ts.shape != (B, C, H, W):
                    ts = jnp.broadcast_to(ts, (B, C, H, W))
                inputs.append(ts)                # passed once, shared by all scale heads
                inputs += [x_scales[k] for k in range(n_sp)]
            else:
                # TODO(synk): non-scalar scales_to_kp factors fall back to materializing the
                # broadcast target (per-channel factors could be folded in-kernel instead).
                for k in range(n_sp):
                    inputs.append(x_scales[k])
                    inputs.append(jnp.broadcast_to(
                        jnp.asarray(target_scale, jnp.float32)
                        * jnp.asarray(s2k_items[k], jnp.float32), (B, C, H, W)))

        fn = _build_loss_fn(B, C, HW, lane_tile, n_tiles, n_split, nv, n_sp,
                            scalar_path, vmem_limit)
        ce, counts, regs, scales = fn(*inputs)   # device arrays, no host sync yet

        if not self.check_empty_masks:
            # Fast path: everything stays on device (assumes non-empty masks, the common
            # case during training); the original module would return None otherwise.
            return [ce] + [regs[i] for i in range(nv)] + [scales[j] for j in range(n_sp)]

        counts_host = np.asarray(counts)         # single tiny D2H read (8 bytes); mirrors
        if counts_host[0] <= 0.0:                # the torch module's torch.any() syncs
            return (None, None, None)
        reg_losses = ([regs[i] for i in range(nv)] if counts_host[1] > 0.0
                      else [None for _ in range(nv)])
        return [ce] + reg_losses + [scales[j] for j in range(n_sp)]

    __call__ = forward


def _reference_forward(loss_obj, x, t):
    """Pure jnp (eager) mirror of the torch forward, for validation."""
    nv, ns = loss_obj.n_vectors, loss_obj.n_scales
    x_intensity = x[0]
    x_regs = x[1:1 + nv]
    x_spreads = x[1 + nv:1 + 2 * nv]
    x_scales = x[1 + 2 * nv:1 + 2 * nv + ns]
    target_intensity = t[0]
    target_regs = t[1:1 + nv]
    target_scale = t[-1]
    B = x_intensity.shape[0]

    bce_masks = (target_intensity[:, :-1] + target_intensity[:, -1:]) > 0.5
    xm = x_intensity[bce_masks]
    tm = target_intensity[:, :-1][bce_masks]
    ce = jnp.mean(jnp.maximum(xm, 0.0) - xm * tm + jnp.log1p(jnp.exp(-jnp.abs(xm))))

    reg_masks = target_intensity[:, :-1] > 0.5
    reg_losses = []
    for x_reg, x_spread, t_reg in zip(x_regs, x_spreads, target_regs):
        x1 = x_reg[:, :, 0][reg_masks]
        x2 = x_reg[:, :, 1][reg_masks]
        logb = x_spread[reg_masks]
        t1 = t_reg[:, :, 0][reg_masks]
        t2 = t_reg[:, :, 1][reg_masks]
        norm = jnp.sqrt((x1 - t1) ** 2 + (x2 - t2) ** 2)
        reg_losses.append(float(jnp.sum(0.694 + logb + norm * jnp.exp(-logb))) / 1000.0 / B)
    scale_losses = [
        float(jnp.sum(jnp.abs(x_scale[reg_masks] - (target_scale * s2k)[reg_masks]))) / 1000.0 / B
        for x_scale, s2k in zip(x_scales, loss_obj.scales_to_kp)]
    return [float(ce)] + reg_losses + scale_losses


def _make_inputs(key, B, C, H, W, dtype=jnp.float32):
    ks = jax.random.split(key, 7)
    x_intensity = jax.random.normal(ks[0], (B, C, H, W), jnp.float32)
    x_reg = jax.random.normal(ks[1], (B, C, 2, H, W), jnp.float32)
    x_spread = jax.random.normal(ks[2], (B, C, H, W), jnp.float32)
    x_scale = jax.random.normal(ks[3], (B, C, H, W), jnp.float32)
    target_intensity = jax.random.uniform(ks[4], (B, C + 1, H, W), jnp.float32)
    target_reg = jax.random.normal(ks[5], (B, C, 2, H, W), jnp.float32)
    target_scale = jax.random.uniform(ks[6], (B, C, H, W), jnp.float32) * 10.0
    x = [a.astype(dtype) for a in (x_intensity, x_reg, x_spread, x_scale)]
    t = [a.astype(dtype) for a in (target_intensity, target_reg, target_scale)]
    return x, t


def _check(loss, x, t, rtol=2e-4, atol=1e-5):
    result = loss(x, t)                                   # runs the Pallas kernel
    result = [jax.block_until_ready(v) for v in result]
    # reference runs on the same values upcast to f32 (what the kernel computes
    # internally), so only summation-order differences remain.
    x32 = [jnp.asarray(a, jnp.float32) for a in x]
    t32 = [jnp.asarray(a, jnp.float32) for a in t]
    ref = _reference_forward(loss, x32, t32)
    np.testing.assert_allclose(
        np.asarray([float(v) for v in result], dtype=np.float32),
        np.asarray(ref, dtype=np.float32), rtol=rtol, atol=atol)


if __name__ == "__main__":
    loss = CompositeLoss("pif", None, n_vectors=1, n_scales=1, sigmas=None)

    # 1) default path: f32, even batch, HW a multiple of 128 (single exact lane tile).
    x, t = _make_inputs(jax.random.PRNGKey(0), B=2, C=4, H=16, W=16)
    _check(loss, x, t)

    # 2) ragged + core-split path: odd batch, HW not a multiple of 128, tiny tile budget
    #    to force multiple lane tiles -> exercises the lane-validity mask, the 2-way
    #    "parallel" lane split and the phantom-tile clamp.
    _TILE_BUDGET_OVERRIDE = 128 * 1024
    x2, t2 = _make_inputs(jax.random.PRNGKey(1), B=1, C=4, H=18, W=18)
    _check(loss, x2, t2)
    _TILE_BUDGET_OVERRIDE = None

    # 3) native bf16 ingestion (upcast happens in-kernel; accumulation stays f32).
    x3, t3 = _make_inputs(jax.random.PRNGKey(2), B=2, C=4, H=16, W=16, dtype=jnp.bfloat16)
    _check(loss, x3, t3)

    print("KERNEL_OK")
</pallas_src>

<mosaic_0001>
module attributes {stable_mosaic.version = 11 : i64} {
  func.func @kernel(%arg0: i32, %arg1: i32, %arg2: i32, %arg3: memref<1xf32, #tpu.memory_space<smem>>, %arg4: memref<1x4x256xf32, #tpu.memory_space<vmem>>, %arg5: memref<1x5x256xf32, #tpu.memory_space<vmem>>, %arg6: memref<1x4x2x256xf32, #tpu.memory_space<vmem>>, %arg7: memref<1x4x256xf32, #tpu.memory_space<vmem>>, %arg8: memref<1x4x2x256xf32, #tpu.memory_space<vmem>>, %arg9: memref<1x4x256xf32, #tpu.memory_space<vmem>>, %arg10: memref<1x4x256xf32, #tpu.memory_space<vmem>>, %arg11: memref<1x1x8x128xf32, #tpu.memory_space<vmem>>) attributes {dimension_semantics = [#tpu.dimension_semantics<parallel>, #tpu.dimension_semantics<parallel>, #tpu.dimension_semantics<arbitrary>], iteration_bounds = array<i64: 1, 2, 1>, scalar_prefetch = 0 : i64, scratch_operands = 0 : i64, tpu.core_type = #tpu.core_type<tc>, window_params = [{transform_indices = @transform_0, window_bounds = array<i64: 1>}, {transform_indices = @transform_1, window_bounds = array<i64: 1, 4, 256>}, {transform_indices = @transform_2, window_bounds = array<i64: 1, 5, 256>}, {transform_indices = @transform_3, window_bounds = array<i64: 1, 4, 2, 256>}, {transform_indices = @transform_4, window_bounds = array<i64: 1, 4, 256>}, {transform_indices = @transform_5, window_bounds = array<i64: 1, 4, 2, 256>}, {transform_indices = @transform_6, window_bounds = array<i64: 1, 4, 256>}, {transform_indices = @transform_7, window_bounds = array<i64: 1, 4, 256>}, {transform_indices = @transform_8, window_bounds = array<i64: 1, 1, 8, 128>}]} {
    %c0 = arith.constant 0 : index
    %c0_0 = arith.constant 0 : index
    %c0_1 = arith.constant 0 : index
    %0 = vector.load %arg4[%c0, %c0_0, %c0_1] : memref<1x4x256xf32, #tpu.memory_space<vmem>>, vector<1x4x256xf32>
    %1 = vector.shape_cast %0 : vector<1x4x256xf32> to vector<4x256xf32>
    %c0_2 = arith.constant 0 : index
    %c0_3 = arith.constant 0 : index
    %c0_4 = arith.constant 0 : index
    %2 = vector.load %arg5[%c0_2, %c0_3, %c0_4] : memref<1x5x256xf32, #tpu.memory_space<vmem>>, vector<1x5x256xf32>
    %3 = vector.shape_cast %2 : vector<1x5x256xf32> to vector<5x256xf32>
    %4 = vector.extract_strided_slice %3 {offsets = [0, 0], sizes = [4, 256], strides = [1, 1]} : vector<5x256xf32> to vector<4x256xf32>
    %5 = vector.extract_strided_slice %3 {offsets = [4, 0], sizes = [1, 256], strides = [1, 1]} : vector<5x256xf32> to vector<1x256xf32>
    %c1_i32 = arith.constant 1 : i32
    %6 = arith.muli %arg0, %c1_i32 : i32
    %7 = arith.addi %6, %arg2 : i32
    %8 = tpu.iota {dimensions = array<i32: 1>} : vector<1x256xi32>
    %c256_i32 = arith.constant 256 : i32
    %9 = arith.muli %7, %c256_i32 : i32
    %10 = vector.broadcast %9 : i32 to vector<1x256xi32>
    %11 = arith.addi %10, %8 : vector<1x256xi32>
    %c256_i32_5 = arith.constant 256 : i32
    %12 = vector.broadcast %c256_i32_5 : i32 to vector<1x256xi32>
    %13 = arith.cmpi slt, %11, %12 : vector<1x256xi32>
    %14 = vector.broadcast %5 : vector<1x256xf32> to vector<4x256xf32>
    %15 = arith.addf %4, %14 : vector<4x256xf32>
    %cst = arith.constant 5.000000e-01 : f32
    %16 = vector.broadcast %cst : f32 to vector<4x256xf32>
    %17 = arith.cmpf ogt, %15, %16 : vector<4x256xf32>
    %18 = vector.broadcast %13 : vector<1x256xi1> to vector<4x256xi1>
    %19 = arith.andi %18, %17 : vector<4x256xi1>
    %cst_6 = arith.constant 5.000000e-01 : f32
    %20 = vector.broadcast %cst_6 : f32 to vector<4x256xf32>
    %21 = arith.cmpf ogt, %4, %20 : vector<4x256xf32>
    %22 = vector.broadcast %13 : vector<1x256xi1> to vector<4x256xi1>
    %23 = arith.andi %22, %21 : vector<4x256xi1>
    %cst_7 = arith.constant 0.000000e+00 : f32
    %24 = vector.broadcast %cst_7 : f32 to vector<4x256xf32>
    %25 = arith.maximumf %1, %24 : vector<4x256xf32>
    %26 = arith.mulf %1, %4 : vector<4x256xf32>
    %27 = arith.subf %25, %26 : vector<4x256xf32>
    %28 = math.absf %1 : vector<4x256xf32>
    %cst_8 = arith.constant 0.000000e+00 : f32
    %29 = vector.broadcast %cst_8 : f32 to vector<4x256xf32>
    %30 = arith.subf %29, %28 : vector<4x256xf32>
    %31 = math.exp %30 : vector<4x256xf32>
    %32 = math.log1p %31 : vector<4x256xf32>
    %33 = arith.addf %27, %32 : vector<4x256xf32>
    %cst_9 = arith.constant 0.000000e+00 : f32
    %34 = vector.broadcast %cst_9 : f32 to vector<4x256xf32>
    %35 = arith.select %19, %33, %34 : vector<4x256xi1>, vector<4x256xf32>
    %36 = vector.shape_cast %35 : vector<4x256xf32> to vector<1x4x256xf32>
    %cst_10 = arith.constant dense<0.000000e+00> : vector<1xf32>
    %37 = vector.multi_reduction <add>, %36, %cst_10 [1, 2] : vector<1x4x256xf32> to vector<1xf32>
    %38 = vector.shape_cast %37 : vector<1xf32> to vector<1x1x1xf32>
    %39 = vector.extract %38[0, 0, 0] : f32 from vector<1x1x1xf32>
    %40 = arith.extui %19 : vector<4x256xi1> to vector<4x256xi32>
    %41 = arith.sitofp %40 : vector<4x256xi32> to vector<4x256xf32>
    %42 = vector.shape_cast %41 : vector<4x256xf32> to vector<1x4x256xf32>
    %cst_11 = arith.constant dense<0.000000e+00> : vector<1xf32>
    %43 = vector.multi_reduction <add>, %42, %cst_11 [1, 2] : vector<1x4x256xf32> to vector<1xf32>
    %44 = vector.shape_cast %43 : vector<1xf32> to vector<1x1x1xf32>
    %45 = vector.extract %44[0, 0, 0] : f32 from vector<1x1x1xf32>
    %46 = arith.extui %23 : vector<4x256xi1> to vector<4x256xi32>
    %47 = arith.sitofp %46 : vector<4x256xi32> to vector<4x256xf32>
    %48 = vector.shape_cast %47 : vector<4x256xf32> to vector<1x4x256xf32>
    %cst_12 = arith.constant dense<0.000000e+00> : vector<1xf32>
    %49 = vector.multi_reduction <add>, %48, %cst_12 [1, 2] : vector<1x4x256xf32> to vector<1xf32>
    %50 = vector.shape_cast %49 : vector<1xf32> to vector<1x1x1xf32>
    %51 = vector.extract %50[0, 0, 0] : f32 from vector<1x1x1xf32>
    %c0_13 = arith.constant 0 : index
    %c0_14 = arith.constant 0 : index
    %c0_15 = arith.constant 0 : index
    %c0_16 = arith.constant 0 : index
    %52 = vector.load %arg6[%c0_13, %c0_14, %c0_15, %c0_16] : memref<1x4x2x256xf32, #tpu.memory_space<vmem>>, vector<1x4x2x256xf32>
    %53 = vector.shape_cast %52 : vector<1x4x2x256xf32> to vector<4x2x256xf32>
    %c0_17 = arith.constant 0 : index
    %c0_18 = arith.constant 0 : index
    %c0_19 = arith.constant 0 : index
    %54 = vector.load %arg7[%c0_17, %c0_18, %c0_19] : memref<1x4x256xf32, #tpu.memory_space<vmem>>, vector<1x4x256xf32>
    %55 = vector.shape_cast %54 : vector<1x4x256xf32> to vector<4x256xf32>
    %c0_20 = arith.constant 0 : index
    %c0_21 = arith.constant 0 : index
    %c0_22 = arith.constant 0 : index
    %c0_23 = arith.constant 0 : index
    %56 = vector.load %arg8[%c0_20, %c0_21, %c0_22, %c0_23] : memref<1x4x2x256xf32, #tpu.memory_space<vmem>>, vector<1x4x2x256xf32>
    %57 = vector.shape_cast %56 : vector<1x4x2x256xf32> to vector<4x2x256xf32>
    %58 = arith.subf %53, %57 : vector<4x2x256xf32>
    %59 = arith.mulf %58, %58 : vector<4x2x256xf32>
    %cst_24 = arith.constant dense<0.000000e+00> : vector<4x256xf32>
    %60 = vector.multi_reduction <add>, %59, %cst_24 [1] : vector<4x2x256xf32> to vector<4x256xf32>
    %61 = math.sqrt %60 : vector<4x256xf32>
    %cst_25 = arith.constant 6.940000e-01 : f32
    %62 = vector.broadcast %cst_25 : f32 to vector<4x256xf32>
    %63 = arith.addf %62, %55 : vector<4x256xf32>
    %cst_26 = arith.constant 0.000000e+00 : f32
    %64 = vector.broadcast %cst_26 : f32 to vector<4x256xf32>
    %65 = arith.subf %64, %55 : vector<4x256xf32>
    %66 = math.exp %65 : vector<4x256xf32>
    %67 = arith.mulf %61, %66 : vector<4x256xf32>
    %68 = arith.addf %63, %67 : vector<4x256xf32>
    %cst_27 = arith.constant 0.000000e+00 : f32
    %69 = vector.broadcast %cst_27 : f32 to vector<4x256xf32>
    %70 = arith.select %23, %68, %69 : vector<4x256xi1>, vector<4x256xf32>
    %71 = vector.shape_cast %70 : vector<4x256xf32> to vector<1x4x256xf32>
    %cst_28 = arith.constant dense<0.000000e+00> : vector<1xf32>
    %72 = vector.multi_reduction <add>, %71, %cst_28 [1, 2] : vector<1x4x256xf32> to vector<1xf32>
    %73 = vector.shape_cast %72 : vector<1xf32> to vector<1x1x1xf32>
    %74 = vector.extract %73[0, 0, 0] : f32 from vector<1x1x1xf32>
    %c0_29 = arith.constant 0 : index
    %c0_30 = arith.constant 0 : index
    %c0_31 = arith.constant 0 : index
    %75 = vector.load %arg9[%c0_29, %c0_30, %c0_31] : memref<1x4x256xf32, #tpu.memory_space<vmem>>, vector<1x4x256xf32>
    %76 = vector.shape_cast %75 : vector<1x4x256xf32> to vector<4x256xf32>
    %c0_32 = arith.constant 0 : index
    %c0_33 = arith.constant 0 : index
    %c0_34 = arith.constant 0 : index
    %77 = vector.load %arg10[%c0_32, %c0_33, %c0_34] : memref<1x4x256xf32, #tpu.memory_space<vmem>>, vector<1x4x256xf32>
    %78 = vector.shape_cast %77 : vector<1x4x256xf32> to vector<4x256xf32>
    %c0_35 = arith.constant 0 : index
    %79 = memref.load %arg3[%c0_35] : memref<1xf32, #tpu.memory_space<smem>>
    %80 = vector.broadcast %79 : f32 to vector<4x256xf32>
    %81 = arith.mulf %76, %80 : vector<4x256xf32>
    %82 = arith.subf %78, %81 : vector<4x256xf32>
    %83 = math.absf %82 : vector<4x256xf32>
    %cst_36 = arith.constant 0.000000e+00 : f32
    %84 = vector.broadcast %cst_36 : f32 to vector<4x256xf32>
    %85 = arith.select %23, %83, %84 : vector<4x256xi1>, vector<4x256xf32>
    %86 = vector.shape_cast %85 : vector<4x256xf32> to vector<1x4x256xf32>
    %cst_37 = arith.constant dense<0.000000e+00> : vector<1xf32>
    %87 = vector.multi_reduction <add>, %86, %cst_37 [1, 2] : vector<1x4x256xf32> to vector<1xf32>
    %88 = vector.shape_cast %87 : vector<1xf32> to vector<1x1x1xf32>
    %89 = vector.extract %88[0, 0, 0] : f32 from vector<1x1x1xf32>
    %90 = tpu.iota {dimensions = array<i32: 0>} : vector<8x128xi32>
    %cst_38 = arith.constant 0.000000e+00 : f32
    %91 = vector.broadcast %cst_38 : f32 to vector<8x128xf32>
    %c0_i32 = arith.constant 0 : i32
    %92 = vector.broadcast %c0_i32 : i32 to vector<8x128xi32>
    %93 = arith.cmpi eq, %90, %92 : vector<8x128xi32>
    %94 = vector.broadcast %39 : f32 to vector<8x128xf32>
    %95 = arith.select %93, %94, %91 : vector<8x128xi1>, vector<8x128xf32>
    %c1_i32_39 = arith.constant 1 : i32
    %96 = vector.broadcast %c1_i32_39 : i32 to vector<8x128xi32>
    %97 = arith.cmpi eq, %90, %96 : vector<8x128xi32>
    %98 = vector.broadcast %45 : f32 to vector<8x128xf32>
    %99 = arith.select %97, %98, %95 : vector<8x128xi1>, vector<8x128xf32>
    %c2_i32 = arith.constant 2 : i32
    %100 = vector.broadcast %c2_i32 : i32 to vector<8x128xi32>
    %101 = arith.cmpi eq, %90, %100 : vector<8x128xi32>
    %102 = vector.broadcast %51 : f32 to vector<8x128xf32>
    %103 = arith.select %101, %102, %99 : vector<8x128xi1>, vector<8x128xf32>
    %c3_i32 = arith.constant 3 : i32
    %104 = vector.broadcast %c3_i32 : i32 to vector<8x128xi32>
    %105 = arith.cmpi eq, %90, %104 : vector<8x128xi32>
    %106 = vector.broadcast %74 : f32 to vector<8x128xf32>
    %107 = arith.select %105, %106, %103 : vector<8x128xi1>, vector<8x128xf32>
    %c4_i32 = arith.constant 4 : i32
    %108 = vector.broadcast %c4_i32 : i32 to vector<8x128xi32>
    %109 = arith.cmpi eq, %90, %108 : vector<8x128xi32>
    %110 = vector.broadcast %89 : f32 to vector<8x128xf32>
    %111 = arith.select %109, %110, %107 : vector<8x128xi1>, vector<8x128xf32>
    %c0_i32_40 = arith.constant 0 : i32
    %112 = arith.cmpi eq, %arg2, %c0_i32_40 : i32
    %113 = arith.extui %112 : i1 to i32
    %c0_i32_41 = arith.constant 0 : i32
    %114 = arith.cmpi ne, %113, %c0_i32_41 : i32
    scf.if %114 {
      %c0_44 = arith.constant 0 : index
      %c0_45 = arith.constant 0 : index
      %c0_46 = arith.constant 0 : index
      %c0_47 = arith.constant 0 : index
      %118 = vector.load %arg11[%c0_44, %c0_45, %c0_46, %c0_47] : memref<1x1x8x128xf32, #tpu.memory_space<vmem>>, vector<1x1x8x128xf32>
      %119 = vector.shape_cast %118 : vector<1x1x8x128xf32> to vector<8x128xf32>
      %120 = vector.shape_cast %111 : vector<8x128xf32> to vector<1x1x8x128xf32>
      tpu.vector_store %arg11[%c0_44, %c0_45, %c0_46, %c0_47], %120 {strides = array<i32>} : memref<1x1x8x128xf32, #tpu.memory_space<vmem>>, vector<1x1x8x128xf32>,
    } else {
    }
    %c0_i32_42 = arith.constant 0 : i32
    %115 = arith.cmpi sgt, %arg2, %c0_i32_42 : i32
    %116 = arith.extui %115 : i1 to i32
    %c0_i32_43 = arith.constant 0 : i32
    %117 = arith.cmpi ne, %116, %c0_i32_43 : i32
    scf.if %117 {
      %c0_44 = arith.constant 0 : index
      %c0_45 = arith.constant 0 : index
      %c0_46 = arith.constant 0 : index
      %c0_47 = arith.constant 0 : index
      %118 = vector.load %arg11[%c0_44, %c0_45, %c0_46, %c0_47] : memref<1x1x8x128xf32, #tpu.memory_space<vmem>>, vector<1x1x8x128xf32>
      %119 = vector.shape_cast %118 : vector<1x1x8x128xf32> to vector<8x128xf32>
      %120 = arith.addf %119, %111 : vector<8x128xf32>
      %c0_48 = arith.constant 0 : index
      %c0_49 = arith.constant 0 : index
      %c0_50 = arith.constant 0 : index
      %c0_51 = arith.constant 0 : index
      %121 = vector.load %arg11[%c0_48, %c0_49, %c0_50, %c0_51] : memref<1x1x8x128xf32, #tpu.memory_space<vmem>>, vector<1x1x8x128xf32>
      %122 = vector.shape_cast %121 : vector<1x1x8x128xf32> to vector<8x128xf32>
      %123 = vector.shape_cast %120 : vector<8x128xf32> to vector<1x1x8x128xf32>
      tpu.vector_store %arg11[%c0_48, %c0_49, %c0_50, %c0_51], %123 {strides = array<i32>} : memref<1x1x8x128xf32, #tpu.memory_space<vmem>>, vector<1x1x8x128xf32>,
    } else {
    }
    return
  }
  func.func @transform_0(%arg0: i32, %arg1: i32, %arg2: i32) -> i32 {
    %c0_i32 = arith.constant 0 : i32
    %c0_i32_0 = arith.constant 0 : i32
    return %c0_i32 : i32
  }
  func.func @transform_1(%arg0: i32, %arg1: i32, %arg2: i32) -> (i32, i32, i32) {
    %c1_i32 = arith.constant 1 : i32
    %0 = arith.muli %arg0, %c1_i32 : i32
    %1 = arith.addi %0, %arg2 : i32
    %c0_i32 = arith.constant 0 : i32
    %2 = arith.minsi %1, %c0_i32 : i32
    %c0_i32_0 = arith.constant 0 : i32
    %c0_i32_1 = arith.constant 0 : i32
    return %arg1, %c0_i32_0, %2 : i32, i32, i32
  }
  func.func @transform_2(%arg0: i32, %arg1: i32, %arg2: i32) -> (i32, i32, i32) {
    %c1_i32 = arith.constant 1 : i32
    %0 = arith.muli %arg0, %c1_i32 : i32
    %1 = arith.addi %0, %arg2 : i32
    %c0_i32 = arith.constant 0 : i32
    %2 = arith.minsi %1, %c0_i32 : i32
    %c0_i32_0 = arith.constant 0 : i32
    %c0_i32_1 = arith.constant 0 : i32
    return %arg1, %c0_i32_0, %2 : i32, i32, i32
  }
  func.func @transform_3(%arg0: i32, %arg1: i32, %arg2: i32) -> (i32, i32, i32, i32) {
    %c1_i32 = arith.constant 1 : i32
    %0 = arith.muli %arg0, %c1_i32 : i32
    %1 = arith.addi %0, %arg2 : i32
    %c0_i32 = arith.constant 0 : i32
    %2 = arith.minsi %1, %c0_i32 : i32
    %c0_i32_0 = arith.constant 0 : i32
    %c0_i32_1 = arith.constant 0 : i32
    %c0_i32_2 = arith.constant 0 : i32
    return %arg1, %c0_i32_0, %c0_i32_1, %2 : i32, i32, i32, i32
  }
  func.func @transform_4(%arg0: i32, %arg1: i32, %arg2: i32) -> (i32, i32, i32) {
    %c1_i32 = arith.constant 1 : i32
    %0 = arith.muli %arg0, %c1_i32 : i32
    %1 = arith.addi %0, %arg2 : i32
    %c0_i32 = arith.constant 0 : i32
    %2 = arith.minsi %1, %c0_i32 : i32
    %c0_i32_0 = arith.constant 0 : i32
    %c0_i32_1 = arith.constant 0 : i32
    return %arg1, %c0_i32_0, %2 : i32, i32, i32
  }
  func.func @transform_5(%arg0: i32, %arg1: i32, %arg2: i32) -> (i32, i32, i32, i32) {
    %c1_i32 = arith.constant 1 : i32
    %0 = arith.muli %arg0, %c1_i32 : i32
    %1 = arith.addi %0, %arg2 : i32
    %c0_i32 = arith.constant 0 : i32
    %2 = arith.minsi %1, %c0_i32 : i32
    %c0_i32_0 = arith.constant 0 : i32
    %c0_i32_1 = arith.constant 0 : i32
    %c0_i32_2 = arith.constant 0 : i32
    return %arg1, %c0_i32_0, %c0_i32_1, %2 : i32, i32, i32, i32
  }
  func.func @transform_6(%arg0: i32, %arg1: i32, %arg2: i32) -> (i32, i32, i32) {
    %c1_i32 = arith.constant 1 : i32
    %0 = arith.muli %arg0, %c1_i32 : i32
    %1 = arith.addi %0, %arg2 : i32
    %c0_i32 = arith.constant 0 : i32
    %2 = arith.minsi %1, %c0_i32 : i32
    %c0_i32_0 = arith.constant 0 : i32
    %c0_i32_1 = arith.constant 0 : i32
    return %arg1, %c0_i32_0, %2 : i32, i32, i32
  }
  func.func @transform_7(%arg0: i32, %arg1: i32, %arg2: i32) -> (i32, i32, i32) {
    %c1_i32 = arith.constant 1 : i32
    %0 = arith.muli %arg0, %c1_i32 : i32
    %1 = arith.addi %0, %arg2 : i32
    %c0_i32 = arith.constant 0 : i32
    %2 = arith.minsi %1, %c0_i32 : i32
    %c0_i32_0 = arith.constant 0 : i32
    %c0_i32_1 = arith.constant 0 : i32
    return %arg1, %c0_i32_0, %2 : i32, i32, i32
  }
  func.func @transform_8(%arg0: i32, %arg1: i32, %arg2: i32) -> (i32, i32, i32, i32) {
    %c0_i32 = arith.constant 0 : i32
    %c0_i32_0 = arith.constant 0 : i32
    %c0_i32_1 = arith.constant 0 : i32
    return %arg0, %arg1, %c0_i32, %c0_i32_0 : i32, i32, i32, i32
  }
}

</mosaic_0001>

<bundles_post_ra>
// kernel: run.1
= control target key start
LH: loop header
LB: loop body
LE: loop exit
PB: predicated region body
PF: predicated region fallthrough
CT: control target
= control target key end

     0   :  { %s1480_s29 = smov 0   ;;  %s1482_s30 = smov 0   ;;  %s1727_s0 = inlined_call_operand.<no memory space> [shape: f32[1], index: 0, kind: input, shape index: {}]   ;;  %s1728_s1 = inlined_call_operand.vmem [shape: f32[2,4,256], index: 1, kind: input, shape index: {}]   ;;  %s1729_s2 = inlined_call_operand.vmem [shape: f32[2,5,256], index: 2, kind: input, shape index: {}]   ;;  %s1730_s3 = inlined_call_operand.vmem [shape: f32[2,4,2,256], index: 3, kind: input, shape index: {}]   ;;  %s1731_s4 = inlined_call_operand.vmem [shape: f32[2,4,256], index: 4, kind: input, shape index: {}]   ;;  %s1732_s5 = inlined_call_operand.vmem [shape: f32[2,4,2,256], index: 5, kind: input, shape index: {}]   ;;  %s1733_s6 = inlined_call_operand.vmem [shape: f32[2,4,256], index: 6, kind: input, shape index: {}]   ;;  %s1734_s7 = inlined_call_operand.vmem [shape: f32[2,4,256], index: 7, kind: input, shape index: {}]   ;;  %s1735_s8 = inlined_call_operand.vmem [shape: f32[1,2,8,128], index: 8, kind: output, shape index: {}]  }
   0x1   :  { %13 = sst [smem:[#allocation2]] %s1727_s0  ;;  %s1484_s9 = smov 0  }
   0x2 LB: > { %s34_s0 = sadd.s32 1, %s1424_s30  ;;  %p1318_p0 = scmp.ge.s32.totalorder %s1428_s9, 1  ;;  %s1428_s9 = sphi %s1484_s9, %s19_s9   ;;  %s1424_s30 = sphi %s1482_s30, %s1756_s30   ;;  %s1420_s29 = sphi %s1480_s29, %s1755_s29  }
   0x3   : > { %p36_p1 = scmp.ge.s32.totalorder %s34_s0, 2  ;;  %p477_p2 = scmp.lt.s32.totalorder %s1428_s9, 3 }
   0x5   : > { %s1758_s0 = smov (%p36_p1, %s34_s0), 0  ;;  %p478_p3 = pnand %p1318_p0, %p477_p2 }
   0x6   : > { %p597_p4 = scmp.lt.s32.totalorder (!%p478_p3), %s1420_s29, 1  ;;  %s1551_s24 = sld [smem:[#allocation2]] (!%p478_p3) }
   0x7   : > { %481 = sbr.rel (%p478_p3) target bundleno = 294 (0x126), region = 52 }
   0xc   : > { %v726_v0 = vlaneseq  ;;  %v1430_v1 = vmov 1983009808   ;;  %s1760_s29 = smov (!%p597_p4, %s1420_s29), 1  ;;  %vm1737_vm0 = vcmask 1043456   ;;  %vm880_vm1 = vcmask 1041408  }
   0xd   : > { %v841_v2 = vunpack.c.l.s4 %v1430_v1  ;;  %s1341_s10 = sshll.u32 %s1760_s29, 4  ;;  %v1431_v27 = vmov 0.0   ;;  %s1545_s20 = sshll.u32 %s1760_s29, 3 }
   0xe   : > { %v1500_v3 = vshrl.u32 %v726_v0, 7  ;;  %s620_s13 = scalar_lea.vmem %s1729_s2, %s1341_s10  ;;  %s636_s16 = scalar_lea.vmem %s1730_s3, %s1341_s10 }
   0xf   : > { %v842_v5 = vunpack.c.0.s8 %v841_v2  ;;  %s668_s19 = scalar_lea.vmem %s1732_s5, %s1341_s10  ;;  %v1513_v6 = vld [vmem:[%s620_s13] sm:$0x1f]  ;;  %v1515_v7 = vld [vmem:[%s620_s13 + $0x8] sm:$0x1f]  ;;  %s604_s23 = scalar_lea.vmem %s1728_s1, %s1545_s20 }
  0x10   : > { %v728_v4 = vsub.s32 4, %v1500_v3  ;;  %v819_v8 = vld [vmem:[%s636_s16] sm:$0xf]  ;;  %v820_v11 = vld [vmem:[%s636_s16 + $0x4] sm:$0xf]  ;;  %vm1740_vm4 = vcmp.gt.f32.partialorder %v1513_v6, 0.5  ;;  %s684_s27 = scalar_lea.vmem %s1733_s6, %s1545_s20  ;;  %s700_s10 = scalar_lea.vmem %s1734_s7, %s1545_s20 }
  0x11   : > { %v821_v12 = vld [vmem:[%s636_s16 + $0x8] sm:$0xf]  ;;  %v822_v13 = vld [vmem:[%s636_s16 + $0xc] sm:$0xf]  ;;  %v824_v14 = vld [vmem:[%s668_s19] sm:$0xf]  ;;  %v845_v17 = vsub.s32 %v842_v5, %v1500_v3  ;;  %s652_s13 = scalar_lea.vmem %s1731_s4, %s1545_s20  ;;  %s712_s21 = scalar_lea.vmem %s1735_s8, %s1545_s20 }
  0x12   : > { %v729_v9 = vrot.slane %v1513_v6, %v728_v4  ;;  %v733_v10 = vrot.slane %v1515_v7, %v728_v4  ;;  %v825_v15 = vld [vmem:[%s668_s19 + $0x4] sm:$0xf]  ;;  %v826_v16 = vld [vmem:[%s668_s19 + $0x8] sm:$0xf]  ;;  %v827_v20 = vld [vmem:[%s668_s19 + $0xc] sm:$0xf]  ;;  %v828_v21 = vsub.f32 %v819_v8, %v824_v14 }
  0x13   : > { %v829_v22 = vsub.f32 %v820_v11, %v825_v15  ;;  %v830_v23 = vsub.f32 %v821_v12, %v826_v16  ;;  %v831_v24 = vsub.f32 %v822_v13, %v827_v20  ;;  %vm1739_vm5 = vcmp.gt.f32.partialorder %v1515_v7, 0.5 }
  0x14   : > { %v1521_v18 = vadd.f32 %v729_v9, %v1513_v6  ;;  %v1524_v19 = vadd.f32 %v733_v10, %v1515_v7  ;;  %v832_v25 = vmul.f32 %v828_v21, %v828_v21  ;;  %v713_v21 = vld [vmem:[%s604_s23] sm:$0xff] }
  0x15   : > { %v833_v26 = vmul.f32 %v829_v22, %v829_v22  ;;  %v834_v30 = vmul.f32 %v830_v23, %v830_v23  ;;  %v835_v31 = vmul.f32 %v831_v24, %v831_v24 }
  0x16   : > { %vm1738_vm2 = vcmp.gt.f32.partialorder %v1521_v18, 0.5  ;;  %vm1736_vm3 = vcmp.gt.f32.partialorder %v1524_v19, 0.5  ;;  %v846_v34 = vrot.slane %v832_v25, %v845_v17 }
  0x17   : > { %v1334_v28 = vsel %vm1738_vm2, 1.0, %v1431_v27  ;;  %v1335_v29 = vsel %vm1736_vm3, 1.0, %v1431_v27  ;;  %v854_v35 = vrot.slane %v833_v26, %v845_v17  ;;  %v862_v37 = vrot.slane %v834_v30, %v845_v17 }
  0x18   : > { %v791_v32 = vsel %vm1737_vm0, %v1334_v28, 0.0  ;;  %v792_v33 = vsel %vm1737_vm0, %v1335_v29, 0.0  ;;  %v870_v38 = vrot.slane %v835_v31, %v845_v17  ;;  %v847_v39 = vcombine.high %v846_v34, %v846_v34 }
  0x19   : > { %v793_v36 = vadd.f32 %v792_v33, %v791_v32  ;;  %v855_v40 = vcombine.high %v854_v35, %v854_v35  ;;  %v881_v41 = vsel %vm880_vm1, %v846_v34, 0.0  ;;  %v895_v42 = vsel %vm880_vm1, %v854_v35, 0.0 }
  0x1a   : > { %v863_v43 = vcombine.high %v862_v37, %v862_v37  ;;  %v871_v44 = vcombine.high %v870_v38, %v870_v38  ;;  %v882_v45 = vrot.slane %v881_v41, 4  ;;  %v896_v46 = vrot.slane %v895_v42, 4 }
  0x1b   : > { %794 = vadd.xlane.f32.xlu0 %v793_v36  ;;  %v888_v47 = vsel %vm880_vm1, %v847_v39, 0.0  ;;  %v902_v48 = vsel %vm880_vm1, %v855_v40, 0.0  ;;  %v909_v49 = vsel %vm880_vm1, %v862_v37, 0.0  ;;  %v923_v50 = vsel %vm880_vm1, %v870_v38, 0.0 }
  0x1c   : > { %v883_v51 = vadd.f32 %v882_v45, %v881_v41  ;;  %v889_v52 = vrot.slane %v888_v47, 4  ;;  %v897_v53 = vadd.f32 %v896_v46, %v895_v42  ;;  %v903_v54 = vrot.slane %v902_v48, 4 }
  0x1d   : > { %v910_v55 = vrot.slane %v909_v49, 4  ;;  %v916_v56 = vsel %vm880_vm1, %v863_v43, 0.0  ;;  %v924_v57 = vrot.slane %v923_v50, 4  ;;  %v930_v58 = vsel %vm880_vm1, %v871_v44, 0.0 }
  0x1e   : > { %v884_v59 = vrot.slane %v883_v51, 2  ;;  %v890_v60 = vadd.f32 %v889_v52, %v888_v47  ;;  %v898_v61 = vrot.slane %v897_v53, 2  ;;  %v904_v62 = vadd.f32 %v903_v54, %v902_v48  ;;  %v1067_v47 = vld [vmem:[%s684_s27] sm:$0xff] }
  0x1f   : > { %v911_v63 = vadd.f32 %v910_v55, %v909_v49  ;;  %v917_v0 = vrot.slane %v916_v56, 4  ;;  %v925_v1 = vadd.f32 %v924_v57, %v923_v50  ;;  %v931_v2 = vrot.slane %v930_v58, 4  ;;  %v1600_v54 = vld [vmem:[%s652_s13] sm:$0xff] }
  0x20   : > { %v885_v4 = vadd.f32 %v884_v59, %v883_v51  ;;  %v891_v5 = vrot.slane %v890_v60, 2  ;;  %v905_v8 = vrot.slane %v904_v62, 2  ;;  %v899_v13 = vadd.f32 %v898_v61, %v897_v53  ;;  %v1068_v53 = vld [vmem:[%s700_s10] sm:$0xff] }
  0x21   : > { %v912_v9 = vrot.slane %v911_v63, 2  ;;  %v918_v10 = vadd.f32 %v917_v0, %v916_v56  ;;  %v932_v11 = vadd.f32 %v931_v2, %v930_v58  ;;  %v926_v14 = vrot.slane %v925_v1, 2 }
  0x22   : > { %v892_v12 = vadd.f32 %v891_v5, %v890_v60  ;;  %v886_v15 = vrot.slane %v885_v4, 1  ;;  %v906_v16 = vadd.f32 %v905_v8, %v904_v62  ;;  %v900_v25 = vrot.slane %v899_v13, 1 }
  0x23   : > { %v913_v17 = vadd.f32 %v912_v9, %v911_v63  ;;  %v919_v20 = vrot.slane %v918_v10, 2  ;;  %v933_v22 = vrot.slane %v932_v11, 2  ;;  %v755_v26 = vand.u32 2147483647, %v713_v21 }
  0x24   : > { %v893_v23 = vrot.slane %v892_v12, 1  ;;  %v1553_v28 = vadd.f32 %v886_v15, %v885_v4  ;;  %v907_v29 = vrot.slane %v906_v16, 1  ;;  %v927_v31 = vadd.f32 %v926_v14, %v925_v1 }
  0x25   : > { %v920_v24 = vadd.f32 %v919_v20, %v918_v10  ;;  %v914_v30 = vrot.slane %v913_v17, 1  ;;  %v934_v32 = vadd.f32 %v933_v22, %v932_v11  ;;  %v756_v33 = vsub.f32 0.0, %v755_v26 }
  0x26   : > { %v1557_v34 = vadd.f32 %v893_v23, %v892_v12  ;;  %v1336_v36 = vsel %vm1740_vm4, 1.0, %v1431_v27  ;;  %v1337_v37 = vsel %vm1739_vm5, 1.0, %v1431_v27  ;;  %v1565_v38 = vadd.f32 %v900_v25, %v899_v13 }
  0x27   : > { %v921_v35 = vrot.slane %v920_v24, 1  ;;  %v757_v39 = vmul.f32 1.442695, %v756_v33  ;;  %v807_v40 = vsel %vm1737_vm0, %v1336_v36, 0.0  ;;  %v808_v41 = vsel %vm1737_vm0, %v1337_v37, 0.0 }
  0x28   : > { %v1573_v42 = vadd.f32 %v907_v29, %v906_v16  ;;  %v928_v43 = vrot.slane %v927_v31, 1  ;;  %1384 = vrsqrt.f32 %v1553_v28  ;;  %v809_v27 = vadd.f32 %v808_v41, %v807_v40 }
  0x29   : > { %v1576_v44 = vadd.f32 %v914_v30, %v913_v17  ;;  %v935_v45 = vrot.slane %v934_v32, 1  ;;  %1386 = vpow2.f32 %v757_v39  ;;  %v1578_v46 = vadd.f32 %v921_v35, %v920_v24 }
  0x2a   : > { %810 = vadd.xlane.f32.xlu1 %v809_v27  ;;  %v1070_v48 = vstv %s1551_s24  ;;  %1388 = vrsqrt.f32 %v1557_v34  ;;  %v1587_v49 = vadd.f32 %v928_v43, %v927_v31  ;;  %v751_v52 = vcombine.low %v1513_v6, %v1515_v7 }
  0x2b   : > { %1390 = vrsqrt.f32 %v1565_v38  ;;  %v1594_v50 = vadd.f32 %v935_v45, %v934_v32  ;;  %v1071_v51 = vmul.f32 %v1070_v48, %v1067_v47  ;;  %v748_v56 = vmax.f32 %v713_v21, 0.0 }
  0x2c   : > { %1392 = vrsqrt.f32 %v1573_v42  ;;  %v753_v57 = vmul.f32 %v751_v52, %v713_v21  ;;  %v994_v58 = vsub.f32 0.0, %v1600_v54  ;;  %vm939_vm6 = vcmp.eq.f32.partialorder %v1553_v28, inf }
  0x2d   : > { %1394 = vrsqrt.f32 %v1576_v44  ;;  %v1072_v55 = vsub.f32 %v1068_v53, %v1071_v51  ;;  %vm941_vm7 = vcmp.eq.f32.partialorder %v1553_v28, 0.0  ;;  %v942_v2 = vand.u32 2147483648, %v1553_v28 }
  0x2e   : > { %1396 = vrsqrt.f32 %v1578_v46  ;;  %v995_v59 = vmul.f32 1.442695, %v994_v58  ;;  %v1607_v63 = vsub.f32 %v748_v56, %v753_v57  ;;  %vm946_vm8 = vcmp.eq.f32.partialorder %v1557_v34, inf }
  0x2f   : > { %1398 = vrsqrt.f32 %v1587_v49  ;;  %v1605_v61 = vand.u32 2147483647, %v1072_v55  ;;  %vm948_vm9 = vcmp.eq.f32.partialorder %v1557_v34, 0.0  ;;  %v949_v5 = vand.u32 2147483648, %v1557_v34 }
  0x30   : > { %1400 = vrsqrt.f32 %v1594_v50  ;;  %vm953_vm10 = vcmp.eq.f32.partialorder %v1565_v38, inf  ;;  %vm955_vm11 = vcmp.eq.f32.partialorder %v1565_v38, 0.0  ;;  %v956_v11 = vand.u32 2147483648, %v1565_v38 }
  0x31   : > { %1402 = vpow2.f32 %v995_v59  ;;  %v1075_v9 = vcombine.high %v1605_v61, %v1605_v61  ;;  %vm960_vm12 = vcmp.eq.f32.partialorder %v1573_v42, inf  ;;  %vm962_vm13 = vcmp.eq.f32.partialorder %v1573_v42, 0.0 }
  0x32   : > { %v963_v14 = vand.u32 2147483648, %v1573_v42  ;;  %vm967_vm14 = vcmp.eq.f32.partialorder %v1576_v44, inf  ;;  %vm969_vm15 = vcmp.eq.f32.partialorder %v1576_v44, 0.0  ;;  %v970_v16 = vand.u32 2147483648, %v1576_v44 }
  0x33   : > { %vm974_vm1 = vcmp.eq.f32.partialorder %v1578_v46, inf  ;;  %vm976_vm3 = vcmp.eq.f32.partialorder %v1578_v46, 0.0  ;;  %v977_v25 = vand.u32 2147483648, %v1578_v46  ;;  %vm981_vm0 = vcmp.eq.f32.partialorder %v1587_v49, inf }
  0x34   : > { %vm983_vm2 = vcmp.eq.f32.partialorder %v1587_v49, 0.0  ;;  %v984_v33 = vand.u32 2147483648, %v1587_v49  ;;  %vm990_vm4 = vcmp.eq.f32.partialorder %v1594_v50, 0.0  ;;  %v991_v27 = vand.u32 2147483648, %v1594_v50 }
  0x35   : > { %v1385_v60 = vpop.eup %1384 }
  0x36   : > { %v1387_v62 = vpop.eup %1386  ;;  %v938_v10 = vmul.f32 %v1385_v60, %v1553_v28 }
  0x37   : > { %v1389_v0 = vpop.eup %1388  ;;  %v759_v1 = vadd.f32 1.0, %v1387_v62  ;;  %v762_v13 = vmul.f32 -0.5, %v1387_v62  ;;  %v765_v23 = vand.u32 2147483647, %v1387_v62 }
  0x38   : > { %v1391_v4 = vpop.eup %1390  ;;  %v945_v17 = vmul.f32 %v1389_v0, %v1557_v34  ;;  %v940_v24 = vsel %vm939_vm6, %v1553_v28, %v938_v10  ;;  %vm988_vm6 = vcmp.eq.f32.partialorder %v1594_v50, inf }
  0x39   : > { %v1393_v8 = vpop.eup %1392  ;;  %1404 = vlog2.f32 %v759_v1  ;;  %v952_v20 = vmul.f32 %v1391_v4, %v1565_v38  ;;  %v763_v29 = vadd.f32 1.0, %v762_v13  ;;  %vm1654_vm5 = vcmp.lt.f32.partialorder %v765_v23, 0.0004427343 }
  0x3a   : > { %v1395_v12 = vpop.eup %1394  ;;  %v959_v30 = vmul.f32 %v1393_v8, %v1573_v42  ;;  %v947_v36 = vsel %vm946_vm8, %v1557_v34, %v945_v17  ;;  %v943_v43 = vsel %vm941_vm7, %v942_v2, %v940_v24  ;;  %vm1746_vm7 = vcmask 1043456  }
  0x3b   : > { %v1397_v15 = vpop.eup %1396  ;;  %v966_v21 = vmul.f32 %v1395_v12, %v1576_v44  ;;  %v954_v37 = vsel %vm953_vm10, %v1565_v38, %v952_v20  ;;  %v764_v45 = vmul.f32 %v1387_v62, %v763_v29  ;;  %v950_v28 = vsel %vm948_vm9, %v949_v5, %v947_v36 }
  0x3c   : > { %v1399_v22 = vpop.eup %1398  ;;  %v973_v31 = vmul.f32 %v1397_v15, %v1578_v46  ;;  %v961_v47 = vsel %vm960_vm12, %v1573_v42, %v959_v30  ;;  %v957_v53 = vsel %vm955_vm11, %v956_v11, %v954_v37  ;;  %vm1039_vm8 = vcmask 1042434   ;;  %vm1748_vm12 = vmmov %vm1746_vm7 }
  0x3d   : > { %v1401_v26 = vpop.eup %1400  ;;  %v980_v32 = vmul.f32 %v1399_v22, %v1587_v49  ;;  %v968_v39 = vsel %vm967_vm14, %v1576_v44, %v966_v21  ;;  %v964_v62 = vsel %vm962_vm13, %v963_v14, %v961_v47  ;;  %vm1041_vm9 = vcmask 1046534   ;;  %vm1749_vm13 = vmmov %vm1746_vm7 }
  0x3e   : > { %v987_v35 = vmul.f32 %v1401_v26, %v1594_v50  ;;  %v975_v48 = vsel %vm974_vm1, %v1578_v46, %v973_v31  ;;  %v1403_v52 = vpop.eup %1402  ;;  %v971_v55 = vsel %vm969_vm15, %v970_v16, %v968_v39  ;;  %vm1747_vm10 = vcmp.gt.f32.partialorder %v1524_v19, 0.5  ;;  %vm1750_vm14 = vmmov %vm1746_vm7 }
  0x3f   : > { %v982_v40 = vsel %vm981_vm0, %v1587_v49, %v980_v32  ;;  %v998_v57 = vcombine.high %v1403_v52, %v1403_v52  ;;  %v999_v58 = vrot.slane %v1403_v52, 1  ;;  %v1001_v59 = vrot.slane %v1403_v52, 2 }
  0x40   : > { %v989_v51 = vsel %vm988_vm6, %v1594_v50, %v987_v35  ;;  %v985_v56 = vsel %vm983_vm2, %v984_v33, %v982_v40  ;;  %v1003_v60 = vrot.slane %v1403_v52, 3  ;;  %v978_v34 = vsel %vm976_vm3, %v977_v25, %v975_v48  ;;  %vm1752_vm6 = vmmov %vm1746_vm7 }
  0x41   : > { %v992_v38 = vsel %vm990_vm4, %v991_v27, %v989_v51  ;;  %v1013_v0 = vmul.f32 %v1403_v52, %v943_v43  ;;  %v1000_v44 = vrot.slane %v998_v57, 1  ;;  %v1002_v2 = vrot.slane %v998_v57, 2 }
  0x42   : > { %v1004_v4 = vrot.slane %v998_v57, 3  ;;  %v1014_v49 = vmul.f32 %v998_v57, %v950_v28  ;;  %v1015_v8 = vmul.f32 %v999_v58, %v957_v53  ;;  %v1017_v10 = vmul.f32 %v1001_v59, %v971_v55 }
  0x43   : > { %v1019_v11 = vmul.f32 %v1003_v60, %v985_v56  ;;  %v1016_v12 = vmul.f32 %v1000_v44, %v964_v62  ;;  %v1018_v13 = vmul.f32 %v1002_v2, %v978_v34  ;;  %vm1743_vm0 = vcmp.gt.f32.partialorder %v1513_v6, 0.5 }
  0x44   : > { %v1020_v42 = vmul.f32 %v1004_v4, %v992_v38  ;;  %v1029_v14 = vcombine.low %v1013_v0, %v1014_v49  ;;  %v1077_v20 = vsel %vm1743_vm0, %v1605_v61, 0.0  ;;  %vm1744_vm2 = vcmp.gt.f32.partialorder %v1515_v7, 0.5  ;;  %vm1751_vm1 = vmmov %vm1743_vm0 }
  0x45   : > { %v1030_v15 = vcombine.low %v1015_v8, %v1016_v12  ;;  %v1031_v16 = vcombine.low %v1017_v10, %v1018_v13  ;;  %v1078_v21 = vsel %vm1744_vm2, %v1075_v9, 0.0  ;;  %vm1034_vm3 = vcmask 1041409   ;;  %vm1753_vm0 = vmmov %vm1744_vm2 }
  0x46   : > { %v1405_v1 = vpop.eup %1404  ;;  %v1032_v17 = vcombine.low %v1019_v11, %v1020_v42  ;;  %vm1036_vm4 = vcmask 1045509   ;;  %vm1044_vm11 = vcmask 1043459   ;;  %v1079_v30 = vsel %vm1749_vm13, %v1077_v20, 0.0  ;;  %vm1754_vm2 = vmmov %vm1752_vm6 }
  0x47   : > { %v761_v5 = vmul.f32 0.6931472, %v1405_v1  ;;  %v1038_v24 = vrot.slane %v1031_v16, 6  ;;  %v1080_v31 = vsel %vm1750_vm14, %v1078_v21, 0.0  ;;  %v993_v33 = vadd.f32 0.694, %v1600_v54 }
  0x48   : > { %v1043_v61 = vrot.slane %v1032_v17, 5  ;;  %vm1046_vm15 = vcmask 1047559   ;;  %v1081_v37 = vadd.f32 %v1080_v31, %v1079_v30 }
  0x49   : > { %v767_v46 = vsel %vm1654_vm5, %v764_v45, %v761_v5  ;;  %vm1745_vm5 = vcmp.gt.f32.partialorder %v1521_v18, 0.5 }
  0x4a   : > { %v768_v50 = vadd.f32 %v767_v46, %v1607_v63  ;;  %v1033_v63 = vrot.slane %v1030_v15, 7 }
  0x4c   : > { %v770_v22 = vcombine.high %v768_v50, %v768_v50  ;;  %v772_v23 = vsel %vm1745_vm5, %v768_v50, 0.0  ;;  %v1035_v29 = vsel %vm1034_vm3, %v1033_v63, %v1029_v14  ;;  %vm1093_vm3 = vcmp.eq.s32.totalorder %v1500_v3, 0 }
  0x4d   : > { %v775_v25 = vsel %vm1746_vm7, %v772_v23, 0.0  ;;  %v1037_v18 = vsel %vm1036_vm4, %v1033_v63, %v1035_v29  ;;  %vm1096_vm4 = vcmp.eq.s32.totalorder %v1500_v3, 1  ;;  %vm1099_vm5 = vcmp.eq.s32.totalorder %v1500_v3, 2 }
  0x4e   : > { %v773_v26 = vsel %vm1747_vm10, %v770_v22, 0.0  ;;  %v1040_v35 = vsel %vm1039_vm8, %v1038_v24, %v1037_v18  ;;  %vm1102_vm7 = vcmp.eq.s32.totalorder %v1500_v3, 3  ;;  %vm1105_vm8 = vcmp.eq.s32.totalorder %v1500_v3, 4 }
  0x4f   : > { %v776_v9 = vsel %vm1748_vm12, %v773_v26, 0.0  ;;  %v1042_v36 = vsel %vm1041_vm9, %v1038_v24, %v1040_v35 }
  0x50   : > { %v777_v32 = vadd.f32 %v776_v9, %v775_v25  ;;  %v1045_v19 = vsel %vm1044_vm11, %v1043_v61, %v1042_v36 }
  0x51   : > { %v1047_v39 = vsel %vm1046_vm15, %v1043_v61, %v1045_v19 }
  0x52   : > { %778 = vadd.xlane.f32.xlu0 %v777_v32  ;;  %v1049_v40 = vadd.f32 %v1047_v39, %v993_v33 }
  0x54   : > { %v1051_v41 = vcombine.high %v1049_v40, %v1049_v40  ;;  %v1053_v43 = vsel %vm1751_vm1, %v1049_v40, 0.0 }
  0x55   : > { %v1055_v27 = vsel %vm1752_vm6, %v1053_v43, 0.0 }
  0x56   : > { %1082 = vadd.xlane.f32.xlu0 %v1081_v37  ;;  %v1054_v45 = vsel %vm1753_vm0, %v1051_v41, 0.0 }
  0x57   : > { %v1056_v54 = vsel %vm1754_vm2, %v1054_v45, 0.0 }
  0x58   : > { %v1057_v47 = vadd.f32 %v1056_v54, %v1055_v27 }
  0x5a   : > { %1058 = vadd.xlane.f32.xlu1 %v1057_v47 }
  0xa4   : > { %v795_v51 = vpop.xlane.xlu0 %794 }
  0xa5   : > { %v796_v52 = vrot.slane %v795_v51, 4 }
  0xa7   : > { %v797_v53 = vadd.f32 %v796_v52, %v795_v51 }
  0xa9   : > { %v798_v56 = vrot.slane %v797_v53, 2 }
  0xab   : > { %v799_v59 = vadd.f32 %v798_v56, %v797_v53 }
  0xad   : > { %v800_v0 = vrot.slane %v799_v59, 1 }
  0xaf   : > { %v801_v8 = vadd.f32 %v800_v0, %v799_v59 }
  0xb3   : > { %v811_v48 = vpop.xlane.xlu1 %810 }
  0xb4   : > { %v812_v28 = vrot.slane %v811_v48, 4 }
  0xb6   : > { %v813_v55 = vadd.f32 %v812_v28, %v811_v48 }
  0xb8   : > { %v814_v57 = vrot.slane %v813_v55, 2 }
  0xba   : > { %v815_v62 = vadd.f32 %v814_v57, %v813_v55 }
  0xbc   : > { %v816_v2 = vrot.slane %v815_v62, 1 }
  0xbe   : > { %v817_v12 = vadd.f32 %v816_v2, %v815_v62 }
  0xdb   : > { %v779_v58 = vpop.xlane.xlu0 %778 }
  0xdc   : > { %v780_v6 = vrot.slane %v779_v58, 4 }
  0xde   : > { %v781_v60 = vadd.f32 %v780_v6, %v779_v58 }
  0xdf   : > { %v1083_v34 = vpop.xlane.xlu0 %1082 }
  0xe0   : > { %v782_v7 = vrot.slane %v781_v60, 2  ;;  %v1084_v38 = vrot.slane %v1083_v34, 4 }
  0xe2   : > { %v1085_v1 = vadd.f32 %v1084_v38, %v1083_v34  ;;  %v783_v44 = vadd.f32 %v782_v7, %v781_v60 }
  0xe3   : > { %v1059_v5 = vpop.xlane.xlu1 %1058 }
  0xe4   : > { %v784_v4 = vrot.slane %v783_v44, 1  ;;  %v1086_v49 = vrot.slane %v1085_v1, 2  ;;  %v1060_v10 = vrot.slane %v1059_v5, 4 }
  0xe6   : > { %v785_v11 = vadd.f32 %v784_v4, %v783_v44  ;;  %v1061_v13 = vadd.f32 %v1060_v10, %v1059_v5  ;;  %v1087_v42 = vadd.f32 %v1086_v49, %v1085_v1 }
  0xe8   : > { %1347 = vpush %v785_v11  ;;  %v1062_v46 = vrot.slane %v1061_v13, 2  ;;  %v1088_v50 = vrot.slane %v1087_v42, 1 }
  0xe9   : > { %1349 = vpush %v801_v8 }
  0xea   : > { %1351 = vpush %v817_v12  ;;  %v1063_v14 = vadd.f32 %v1062_v46, %v1061_v13  ;;  %v1089_v17 = vadd.f32 %v1088_v50, %v1087_v42 }
  0xec   : > { %v1064_v15 = vrot.slane %v1063_v14, 1 }
  0xee   : > { %v1065_v16 = vadd.f32 %v1064_v15, %v1063_v14 }
  0xf0   : > { %1353 = vpush %v1065_v16 }
  0xf1   : > { %1355 = vpush %v1089_v17 }
 0x119   : > { %s1348_s14 = spop %1347 }
 0x11a   : > { %v1094_v20 = vstv %s1348_s14  ;;  %s1350_s15 = spop %1349 }
 0x11b   : > { %v1095_v21 = vsel %vm1093_vm3, %v1094_v20, 0.0  ;;  %v1097_v22 = vstv %s1350_s15  ;;  %s1352_s16 = spop %1351 }
 0x11c   : > { %v1098_v23 = vsel %vm1096_vm4, %v1097_v22, %v1095_v21  ;;  %v1100_v63 = vstv %s1352_s16 }
 0x11d   : > { %v1101_v24 = vsel %vm1099_vm5, %v1100_v63, %v1098_v23 }
 0x121   : > { %s1354_s17 = spop %1353 }
 0x122   : > { %v1103_v25 = vstv %s1354_s17  ;;  %s1356_s22 = spop %1355 }
 0x123   : > { %v1104_v26 = vsel %vm1102_vm7, %v1103_v25, %v1101_v24  ;;  %v1106_v29 = vstv %s1356_s22 }
 0x124   : > { %v1107_v61 = vsel %vm1105_vm8, %v1106_v29, %v1104_v26 }
 0x125   : > { %1112 = vst [vmem:[%s712_s21] sm:$0xff] %v1107_v61 }
 0x126 PF: > { %s19_s9 = sadd.s32 1, %s1428_s9   ;;  %s1755_s29 = smov %s1424_s30 }
 0x127   : > { %p16_p5 = scmp.ge.s32.totalorder %s19_s9, 4   ;;  %s1756_s30 = smov %s1758_s0 }
 0x129   :  { %18 = sbr.rel (!%p16_p5) target bundleno = 2 (0x2), region = 108 }

</bundles_post_ra>
